<compile_context>
chip_gen: v5e
topology: v5e:2x2
jax: 0.10.0
libtpu: 0.0.40
codegen_flags: <defaults>
</compile_context>

<pallas_src>
from math import sqrt

import jax
import jax.numpy as jnp
from jax.experimental import pallas as pl
from jax.experimental.pallas import tpu as pltpu


# ---------------------------------------------------------------------------
# Kernels
# ---------------------------------------------------------------------------
def _make_fused_kernel(compute_dtype):
    # Whole contraction (K) in one tile: single MXU dot + bias + lane-dense store.
    def kernel(x_ref, w_ref, b_ref, o_ref):
        xt = x_ref[...]
        wt = w_ref[...]
        if compute_dtype is not None:
            xt = xt.astype(compute_dtype)
            wt = wt.astype(compute_dtype)
        acc = jnp.dot(xt, wt, preferred_element_type=jnp.float32)
        o_ref[...] = (acc + b_ref[...].astype(jnp.float32)).astype(o_ref.dtype)

    return kernel


def _make_ksplit_kernel(compute_dtype):
    # grid = (M//tm, N//tn, K//tk); K innermost ("arbitrary") reduction axis.
    def kernel(x_ref, w_ref, b_ref, o_ref, acc_ref):
        k = pl.program_id(2)

        @pl.when(k == 0)
        def _():
            acc_ref[...] = jnp.zeros_like(acc_ref)

        xt = x_ref[...]
        wt = w_ref[...]
        if compute_dtype is not None:
            xt = xt.astype(compute_dtype)
            wt = wt.astype(compute_dtype)
        acc_ref[...] += jnp.dot(xt, wt, preferred_element_type=jnp.float32)

        @pl.when(k == pl.num_programs(2) - 1)
        def _():
            # bias broadcasts over the batch (row) dimension, added once at the end
            o_ref[...] = (acc_ref[...] + b_ref[...].astype(jnp.float32)).astype(
                o_ref.dtype
            )

    return kernel


# ---------------------------------------------------------------------------
# Helpers
# ---------------------------------------------------------------------------
def _round_up(v, m):
    return -(-v // m) * m


def _balanced_tile(dim, target, align):
    """Smallest align-multiple tile that covers `dim` in ceil(dim/target) chunks.

    Divisor-aware: e.g. dim=1536, target=1024 -> 768 (no padding) instead of
    1024 (25% padding waste)."""
    chunks = max(1, -(-dim // target))
    t = -(-dim // chunks)
    return _round_up(t, align)


def _vmem_budget_bytes():
    """Generation-aware VMEM budget for tile sizing / vmem_limit_bytes."""
    try:
        cap = int(pltpu.get_tpu_info().vmem_capacity_bytes)
    except Exception:
        cap = 64 << 20  # conservative fallback (v7x per-TC size)
    if cap >= (128 << 20):
        # v5e / v6e: 128 MiB physical -> use most of it, keep headroom
        return 100 << 20
    # v7x (64 MiB per TC) or unknown: never request the full physical VMEM
    return min(48 << 20, (cap * 3) // 4)


def _pad2(a, rows, cols):
    pr = rows - a.shape[0]
    pc = cols - a.shape[1]
    if pr == 0 and pc == 0:
        return a
    return jnp.pad(a, ((0, pr), (0, pc)))


# ---------------------------------------------------------------------------
# Public entry point: y = b + x @ W  (matches torch Linear.forward semantics)
# ---------------------------------------------------------------------------
def linear(x, W, b, *, tm=512, tn=1024, tk=1024, compute_dtype=None,
           vmem_budget_bytes=None):
    M, K = x.shape
    Kw, N = W.shape
    assert K == Kw and b.shape == (N,)
    out_dtype = x.dtype

    budget = (
        int(vmem_budget_bytes) if vmem_budget_bytes is not None
        else _vmem_budget_bytes()
    )
    frac = 0.9  # usable fraction of the budget for double-buffered tile windows

    x_it = jnp.dtype(x.dtype).itemsize
    w_it = jnp.dtype(W.dtype).itemsize
    b_it = jnp.dtype(b.dtype).itemsize
    o_it = jnp.dtype(out_dtype).itemsize

    def footprint(tm_, tn_, tk_, ksplit_):
        # double-buffered x/W/b windows + double-buffered output (+ f32 accumulator)
        f = 2 * (tm_ * tk_ * x_it + tk_ * tn_ * w_it + tn_ * b_it) + 2 * tm_ * tn_ * o_it
        if ksplit_:
            f += tm_ * tn_ * 4
        return f

    # Balanced, HW-aligned tiles (8 sublanes / 128 lanes); N is always rounded up to a
    # lane-dense >=128 tile so output stores are never masked.
    tm = _balanced_tile(M, tm, 8)
    tn = _balanced_tile(N, tn, 128)

    # v7x has 2 TensorCores sharded across the "parallel" grid axes; make sure the
    # parallel grid has at least 2 blocks. Near-free on 1-TC chips (one extra step).
    if (_round_up(M, tm) // tm) * (_round_up(N, tn) // tn) == 1:
        if N >= 256:
            tn = _round_up(-(-N // 2), 128)
        elif M >= 16:
            tm = _round_up(-(-M // 2), 8)

    # Whole-K fused path whenever the full K-strip fits the VMEM budget.
    ksplit = footprint(tm, tn, K, ksplit_=False) > frac * budget
    if not ksplit:
        tk = K
    else:
        tk = _balanced_tile(K, tk, 128)
        # Shrink tiles until the double-buffered footprint fits the budget.
        while footprint(tm, tn, tk, ksplit_=True) > frac * budget:
            if tn > 128:
                tn = max(128, _round_up(tn // 2, 128))
            elif tm > 8:
                tm = max(8, _round_up(tm // 2, 8))
            elif tk > 128:
                tk = max(128, _round_up(tk // 2, 128))
            else:
                break

    Mp = _round_up(M, tm)
    Np = _round_up(N, tn)
    Kp = K if not ksplit else _round_up(K, tk)

    # Zero-pad to whole tiles only when unavoidable (exact for matmul+bias; padded
    # rows/cols are sliced off below).
    # TODO(synk): in a stateful module, hoist the W/b padding to __init__ so the weight
    # is never re-materialized in HBM on the forward path.
    xp = _pad2(x, Mp, Kp)
    Wp = _pad2(W, Kp, Np)
    bp = _pad2(b.reshape(1, N), 1, Np)  # lane-dense (1, Np) bias

    vmem_limit = int(budget)
    out_shape = jax.ShapeDtypeStruct((Mp, Np), out_dtype)

    if not ksplit:
        grid = (Mp // tm, Np // tn)
        out_p = pl.pallas_call(
            _make_fused_kernel(compute_dtype),
            out_shape=out_shape,
            grid_spec=pltpu.PrefetchScalarGridSpec(
                num_scalar_prefetch=0,
                grid=grid,
                in_specs=[
                    pl.BlockSpec((tm, tk), lambda i, j: (i, 0)),   # x strip
                    pl.BlockSpec((tk, tn), lambda i, j: (0, j)),   # W strip
                    pl.BlockSpec((1, tn), lambda i, j: (0, j)),    # bias tile
                ],
                out_specs=pl.BlockSpec((tm, tn), lambda i, j: (i, j)),
            ),
            compiler_params=pltpu.CompilerParams(
                dimension_semantics=("parallel", "parallel"),
                vmem_limit_bytes=vmem_limit,
            ),
        )(xp, Wp, bp)
    else:
        grid = (Mp // tm, Np // tn, Kp // tk)
        out_p = pl.pallas_call(
            _make_ksplit_kernel(compute_dtype),
            out_shape=out_shape,
            grid_spec=pltpu.PrefetchScalarGridSpec(
                num_scalar_prefetch=0,
                grid=grid,
                in_specs=[
                    pl.BlockSpec((tm, tk), lambda i, j, k: (i, k)),  # x tile
                    pl.BlockSpec((tk, tn), lambda i, j, k: (k, j)),  # W tile
                    pl.BlockSpec((1, tn), lambda i, j, k: (0, j)),   # bias (k-invariant)
                ],
                out_specs=pl.BlockSpec((tm, tn), lambda i, j, k: (i, j)),
                scratch_shapes=[pltpu.VMEM((tm, tn), jnp.float32)],
            ),
            compiler_params=pltpu.CompilerParams(
                dimension_semantics=("parallel", "parallel", "arbitrary"),
                vmem_limit_bytes=vmem_limit,
            ),
        )(xp, Wp, bp)

    if (Mp, Np) != (M, N):
        out_p = out_p[:M, :N]
    return out_p


# ---------------------------------------------------------------------------
# Self-test
# ---------------------------------------------------------------------------
if __name__ == "__main__":
    # --- Small shapes implied by the module: batch=8, in_features=32, out_features=64 ---
    in_features, out_features, batch = 32, 64, 8
    key = jax.random.PRNGKey(0)
    kx, kw, kb = jax.random.split(key, 3)

    # Deterministic init mirroring torch uniform_(-1/sqrt(fan), 1/sqrt(fan))
    w_bound = 1.0 / sqrt(in_features)
    b_bound = 1.0 / sqrt(out_features)
    W = jax.random.uniform(
        kw, (in_features, out_features), jnp.float32, minval=-w_bound, maxval=w_bound
    )
    b = jax.random.uniform(
        kb, (out_features,), jnp.float32, minval=-b_bound, maxval=b_bound
    )
    x = jax.random.normal(kx, (batch, in_features), jnp.float32)

    y = linear(x, W, b)
    jax.block_until_ready(y)
    y_ref = b + x @ W
    assert y.shape == (batch, out_features)
    assert jnp.allclose(y, y_ref, atol=1e-5, rtol=1e-5)

    # --- Medium shapes: exercises the big-tile fused (whole-K-in-VMEM) path ---
    M2, K2, N2 = 512, 2048, 1024
    k2x, k2w, k2b = jax.random.split(jax.random.PRNGKey(1), 3)
    W2 = jax.random.uniform(
        k2w, (K2, N2), jnp.float32, minval=-1.0 / sqrt(K2), maxval=1.0 / sqrt(K2)
    )
    b2 = jax.random.uniform(
        k2b, (N2,), jnp.float32, minval=-1.0 / sqrt(N2), maxval=1.0 / sqrt(N2)
    )
    x2 = jax.random.normal(k2x, (M2, K2), jnp.float32)

    y2 = linear(x2, W2, b2)
    jax.block_until_ready(y2)
    y2_ref = b2 + jnp.matmul(x2, W2, precision=jax.lax.Precision.HIGHEST)
    # loose tolerance: default MXU f32 precision + different K-summation order
    assert y2.shape == (M2, N2)
    assert jnp.allclose(y2, y2_ref, atol=2e-2, rtol=2e-2)

    # --- Force the K-split accumulator path (small VMEM budget override) ---
    M3, K3, N3 = 256, 4096, 512
    k3x, k3w, k3b = jax.random.split(jax.random.PRNGKey(2), 3)
    W3 = jax.random.uniform(
        k3w, (K3, N3), jnp.float32, minval=-1.0 / sqrt(K3), maxval=1.0 / sqrt(K3)
    )
    b3 = jax.random.uniform(
        k3b, (N3,), jnp.float32, minval=-1.0 / sqrt(N3), maxval=1.0 / sqrt(N3)
    )
    x3 = jax.random.normal(k3x, (M3, K3), jnp.float32)

    y3 = linear(x3, W3, b3, vmem_budget_bytes=16 << 20)
    jax.block_until_ready(y3)
    y3_ref = b3 + jnp.matmul(x3, W3, precision=jax.lax.Precision.HIGHEST)
    assert y3.shape == (M3, N3)
    assert jnp.allclose(y3, y3_ref, atol=2e-2, rtol=2e-2)

    print("KERNEL_OK")
</pallas_src>

<mosaic_0001>
module attributes {stable_mosaic.version = 11 : i64} {
  func.func @kernel(%arg0: i32, %arg1: i32, %arg2: memref<8x32xf32, #tpu.memory_space<vmem>>, %arg3: memref<32x128xf32, #tpu.memory_space<vmem>>, %arg4: memref<1x128xf32, #tpu.memory_space<vmem>>, %arg5: memref<8x128xf32, #tpu.memory_space<vmem>>) attributes {dimension_semantics = [#tpu.dimension_semantics<parallel>, #tpu.dimension_semantics<parallel>], iteration_bounds = array<i64: 1, 1>, scalar_prefetch = 0 : i64, scratch_operands = 0 : i64, tpu.core_type = #tpu.core_type<tc>, window_params = [{transform_indices = @transform_0, window_bounds = array<i64: 8, 32>}, {transform_indices = @transform_1, window_bounds = array<i64: 32, 128>}, {transform_indices = @transform_2, window_bounds = array<i64: 1, 128>}, {transform_indices = @transform_3, window_bounds = array<i64: 8, 128>}]} {
    %c0 = arith.constant 0 : index
    %c0_0 = arith.constant 0 : index
    %0 = vector.load %arg2[%c0, %c0_0] : memref<8x32xf32, #tpu.memory_space<vmem>>, vector<8x32xf32>
    %c0_1 = arith.constant 0 : index
    %c0_2 = arith.constant 0 : index
    %1 = vector.load %arg3[%c0_1, %c0_2] : memref<32x128xf32, #tpu.memory_space<vmem>>, vector<32x128xf32>
    %cst = arith.constant dense<0.000000e+00> : vector<8x128xf32>
    %2 = tpu.matmul %0, %1, %cst {dimension_numbers = #tpu.dot_dimension_numbers<[1], [0], [0], [1], [0, 0, 1, 1], [], []>} : vector<8x32xf32>, vector<32x128xf32>, vector<8x128xf32> -> vector<8x128xf32>
    %c0_3 = arith.constant 0 : index
    %c0_4 = arith.constant 0 : index
    %3 = vector.load %arg4[%c0_3, %c0_4] : memref<1x128xf32, #tpu.memory_space<vmem>>, vector<1x128xf32>
    %4 = vector.broadcast %3 : vector<1x128xf32> to vector<8x128xf32>
    %5 = arith.addf %2, %4 : vector<8x128xf32>
    %c0_5 = arith.constant 0 : index
    %c0_6 = arith.constant 0 : index
    %6 = vector.load %arg5[%c0_5, %c0_6] : memref<8x128xf32, #tpu.memory_space<vmem>>, vector<8x128xf32>
    tpu.vector_store %arg5[%c0_5, %c0_6], %5 {strides = array<i32>} : memref<8x128xf32, #tpu.memory_space<vmem>>, vector<8x128xf32>,
    return
  }
  func.func @transform_0(%arg0: i32, %arg1: i32) -> (i32, i32) {
    %c0_i32 = arith.constant 0 : i32
    %c0_i32_0 = arith.constant 0 : i32
    return %arg0, %c0_i32 : i32, i32
  }
  func.func @transform_1(%arg0: i32, %arg1: i32) -> (i32, i32) {
    %c0_i32 = arith.constant 0 : i32
    %c0_i32_0 = arith.constant 0 : i32
    return %c0_i32, %arg1 : i32, i32
  }
  func.func @transform_2(%arg0: i32, %arg1: i32) -> (i32, i32) {
    %c0_i32 = arith.constant 0 : i32
    %c0_i32_0 = arith.constant 0 : i32
    return %c0_i32, %arg1 : i32, i32
  }
  func.func @transform_3(%arg0: i32, %arg1: i32) -> (i32, i32) {
    %c0_i32 = arith.constant 0 : i32
    return %arg0, %arg1 : i32, i32
  }
}

</mosaic_0001>

<bundles_post_ra>
// kernel: tpu_custom_call.1
= control target key start
LH: loop header
LB: loop body
LE: loop exit
PB: predicated region body
PF: predicated region fallthrough
CT: control target
= control target key end

     0   :  { %8 = vsyncpa [#allocation3], 0  ;;  %s219_s0 = inlined_call_operand.hbm [shape: f32[8,32], index: 0, kind: input, shape index: {}]   ;;  %s220_s1 = inlined_call_operand.hbm [shape: f32[32,128], index: 1, kind: input, shape index: {}]   ;;  %s221_s2 = inlined_call_operand.vmem [shape: f32[1,128], index: 2, kind: input, shape index: {}]   ;;  %s222_s3 = inlined_call_operand.hbm [shape: f32[8,128], index: 3, kind: output, shape index: {}]  }
   0x1   :  { %9 = vsyncpa [#allocation6], 0 }
   0x2   :  { %10 = vsyncpa [#allocation4], 0  ;;  %s16_s14 = sshll.u32 %s219_s0, 4  ;;  %s182_s15 = smov [#allocation2]   ;;  %s17_s14 = int_to_ptr.hbm [resolvable:$true] %s16_s14 }
   0x3   :  { %s18_s16 = sshll.u32 %s182_s15, 4  ;;  %s26_s19 = sshll.u32 %s220_s1, 4  ;;  %s19_s16 = int_to_ptr.vmem [resolvable:$true] %s18_s16  ;;  %s27_s19 = int_to_ptr.hbm [resolvable:$true] %s26_s19 }
   0x4   :  { %21 = dma.hbm_to_vmem [thread:$0]  %s17_s14, 128, %s19_s16, [#allocation3]  }
   0x5   :  { %s183_s20 = smov [#allocation5]   ;;  %s184_s22 = smov 128  }
   0x6   :  { %s28_s21 = sshll.u32 %s183_s20, 4  ;;  %s185_s23 = smov 8   ;;  %s29_s21 = int_to_ptr.vmem [resolvable:$true] %s28_s21 }
   0x7   :  { %34 = dma.hbm_to_vmem [thread:$0]  %s27_s19, 512, %s29_s21, [#allocation6], %s184_s22, %s184_s22, %s185_s23  }
   0x8   :  { %176 = dma.done.wait [#allocation3], 128  }
   0x9   :  { %177 = vsyncadd [#allocation3], 4294967168 }
   0xa   :  { %178 = dma.done.wait [#allocation6], 512  }
   0xb   :  { %179 = vsyncadd [#allocation6], 4294966784  ;;  %v49_v0 = vld [vmem:[#allocation5 + $0x18] sm:$0xff]  ;;  %v48_v1 = vld [vmem:[#allocation5 + $0x10] sm:$0xff]  ;;  %vm54_vm0 = vcmask 261120   ;;  %s186_s24 = smov [#allocation7]  }
   0xc   :  { %70 = vmatpush.msra.mxu0 %v49_v0  ;;  %v47_v2 = vld [vmem:[#allocation5 + $0x8] sm:$0xff]  ;;  %v46_v3 = vld [vmem:[#allocation5] sm:$0xff]  ;;  %v45_v4 = vld [vmem:[#allocation2] sm:$0xff]  ;;  %s84_s25 = sshll.u32 %s186_s24, 4  ;;  %s86_s28 = sshll.u32 %s222_s3, 4  ;;  %s85_s25 = int_to_ptr.vmem [resolvable:$true] %s84_s25  ;;  %s87_s28 = int_to_ptr.hbm [resolvable:$true] %s86_s28 }
   0xd   :  { %v103_v5 = vld [vmem:[%s221_s2] ss:$0 sm:$0xff] }
   0xe   :  { %71 = vmatpush.msra.mxu0 %v48_v1 }
  0x10   :  { %72 = vmatpush.msra.mxu0 %v47_v2 }
  0x12   :  { %73 = vmatpush.msra.mxu0 %v46_v3 }
  0x13   :  { %97 = vmatmul.msk.f32.vlgmr.msra.gmra.mxu0 %vm54_vm0, %v45_v4 }
  0x90   :  { %v75_v6 = vpop.f32.mrf.mxu0 }
  0x91   :  { %v76_v7 = vadd.f32 %v103_v5, %v75_v6 }
  0x93   :  { %78 = vst [vmem:[#allocation7] sm:$0xff] %v76_v7 }
  0x94   :  { %89 = dma.vmem_to_hbm [thread:$0]  %s85_s25, 128, %s87_s28, [#allocation4]  }
  0x95   :  { %180 = dma.done.wait [#allocation4], 128  }
  0x96   :  { %181 = vsyncadd [#allocation4], 4294967168 }
  0x97   :  { %94 = vsyncpa [#allocation3], 1 }
  0x98   :  { %95 = vsyncpa [#allocation6], 1 }
  0x99   :  { %96 = vsyncpa [#allocation4], 1 }

</bundles_post_ra>
